<compile_context>
chip_gen: v7x
topology: tpu7x:2x2x1
jax: 0.10.0
libtpu: 0.0.40
codegen_flags: <defaults>
</compile_context>

<pallas_src>
import functools

import jax
import jax.numpy as jnp
import numpy as np
from jax.experimental import pallas as pl
from jax.experimental.pallas import tpu as pltpu


# ----------------------------------------------------------------------------
# Pallas kernel: one grid step = one batch element; all resnet blocks run in
# an in-kernel loop over VMEM-resident stacked weights.
# Layout inside the kernel: (C, HW)  — channels in sublanes, pixels in lanes.
# ----------------------------------------------------------------------------
def _resnet2d_kernel(x_ref, w1_ref, w2_ref, w3_ref, mask_ref, o_ref, *, W, eps):
    _, C, HW = x_ref.shape
    B = w1_ref.shape[0]

    x0 = x_ref[0].astype(jnp.float32)      # (C, HW) residual / activation
    masks = mask_ref[...]                  # (9, HW) tap validity masks

    def inorm_relu(y):
        # InstanceNorm2d(affine=False): biased variance, eps inside rsqrt.
        mean = jnp.mean(y, axis=1, keepdims=True)
        c = y - mean                       # centered tensor reused for var + norm
        var = jnp.mean(c * c, axis=1, keepdims=True)
        return jnp.maximum(c * jax.lax.rsqrt(var + eps), 0.0)

    def block_body(b, x):
        # --- 1x1 conv (channel mix): (C,C)@(C,HW), HW in the wide MXU dim ---
        y = inorm_relu(jnp.dot(w1_ref[b], x, preferred_element_type=jnp.float32))

        # --- 3x3 'same' conv as ONE matmul: im2col the 9 taps into (9C, HW).
        # Each tap p -> y[p + s] is a static lane rotation (XLU) masked by a
        # precomputed per-pixel validity mask (handles all image borders).
        taps = []
        for kh in range(3):
            for kw in range(3):
                k = kh * 3 + kw
                s = (kh - 1) * W + (kw - 1)            # flattened spatial shift
                if s == 0:
                    taps.append(y)                      # center tap: always valid
                else:
                    t = pltpu.roll(y, (-s) % HW, axis=1)   # t[:, p] = y[:, p + s]
                    taps.append(t * masks[k:k + 1, :])
        tcol = jnp.concatenate(taps, axis=0)            # (9C, HW)
        y = inorm_relu(jnp.dot(w2_ref[b], tcol, preferred_element_type=jnp.float32))

        # --- 1x1 conv ---
        y = inorm_relu(jnp.dot(w3_ref[b], y, preferred_element_type=jnp.float32))

        # --- residual add; f32 carry through the block loop ---
        return y + x

    out = jax.lax.fori_loop(0, B, block_body, x0, unroll=True)
    o_ref[0] = out.astype(o_ref.dtype)


def _resnet2d_pallas(x, w1s, w2s, w3s, masks, *, H, W):
    """x: (N, C, H*W). w1s/w3s: (B, C, C). w2s: (B, C, 9C). masks: (9, H*W)."""
    N, C, HW = x.shape
    B = w1s.shape[0]
    kernel = functools.partial(_resnet2d_kernel, W=W, eps=1e-5)
    return pl.pallas_call(
        kernel,
        out_shape=jax.ShapeDtypeStruct((N, C, HW), x.dtype),
        grid=(N,),
        in_specs=[
            # Per-image activation block (lane-dense: last dim = HW).
            pl.BlockSpec((1, C, HW), lambda n: (n, 0, 0)),
            # Whole weight stacks VMEM-resident (constant index maps -> no
            # per-image re-fetch).
            pl.BlockSpec((B, C, C), lambda n: (0, 0, 0)),
            pl.BlockSpec((B, C, 9 * C), lambda n: (0, 0, 0)),
            pl.BlockSpec((B, C, C), lambda n: (0, 0, 0)),
            # 3x3 tap validity masks (tiny, resident).
            pl.BlockSpec((9, HW), lambda n: (0, 0)),
        ],
        out_specs=pl.BlockSpec((1, C, HW), lambda n: (n, 0, 0)),
        compiler_params=pltpu.CompilerParams(
            dimension_semantics=("parallel",),
            # Actual footprint is well under 1 MiB at these shapes; explicit
            # budget that is valid on v5e (16 MiB scoped) through v7x (64 MiB).
            vmem_limit_bytes=16 * 1024 * 1024,
        ),
    )(x, w1s, w2s, w3s, masks)


def _tap_masks(H, W):
    """(9, H*W) float32 validity masks for the 3x3 'same' conv taps."""
    hh = np.repeat(np.arange(H), W)
    ww = np.tile(np.arange(W), H)
    m = np.zeros((9, H * W), np.float32)
    for kh in range(3):
        for kw in range(3):
            dh, dw = kh - 1, kw - 1
            valid = ((hh + dh >= 0) & (hh + dh < H) &
                     (ww + dw >= 0) & (ww + dw < W))
            m[kh * 3 + kw] = valid.astype(np.float32)
    return jnp.asarray(m)


# ----------------------------------------------------------------------------
# Wrapper: ResNet2D.forward, PyTorch NCHW in / NCHW out, all blocks fused.
# ----------------------------------------------------------------------------
def resnet2d_forward(x_nchw, params):
    N, C, H, W = x_nchw.shape
    HW = H * W
    x = x_nchw.reshape(N, C, HW)                      # pure reshape, no transpose
    # PyTorch conv weights:
    #  1x1: (Cout, Cin, 1, 1) -> (Cout, Cin)   (used directly as matmul LHS)
    #  3x3: (Cout, Cin, 3, 3) -> (Cout, 9*Cin) ordered (kh, kw, cin) to match
    #       the in-kernel im2col row ordering.
    w1s = jnp.stack([w1[:, :, 0, 0] for (w1, _, _) in params])
    w2s = jnp.stack([jnp.transpose(w2, (0, 2, 3, 1)).reshape(C, 9 * C)
                     for (_, w2, _) in params])
    w3s = jnp.stack([w3[:, :, 0, 0] for (_, _, w3) in params])
    masks = _tap_masks(H, W)
    y = _resnet2d_pallas(x, w1s, w2s, w3s, masks, H=H, W=W)
    return y.reshape(N, C, H, W)


# ----------------------------------------------------------------------------
# Pure-JAX reference (correctness verification).
# ----------------------------------------------------------------------------
def resnet2d_reference(x_nchw, params, eps=1e-5):
    def conv(x, w):
        return jax.lax.conv_general_dilated(
            x, w, window_strides=(1, 1), padding="SAME",
            dimension_numbers=("NCHW", "OIHW", "NCHW"))

    def inorm_relu(y):
        mean = y.mean(axis=(2, 3), keepdims=True)
        var = ((y - mean) ** 2).mean(axis=(2, 3), keepdims=True)
        return jnp.maximum((y - mean) * jax.lax.rsqrt(var + eps), 0.0)

    x = x_nchw
    for (w1, w2, w3) in params:
        residual = x
        y = inorm_relu(conv(x, w1))
        y = inorm_relu(conv(y, w2))
        y = inorm_relu(conv(y, w3))
        x = y + residual
    return x


# ----------------------------------------------------------------------------
# Deterministic parameter init (ResNet2DBlock shapes, bias=False).
# ----------------------------------------------------------------------------
def init_params(key, embed_dim, num_blocks, kernel_size=3):
    params = []
    for _ in range(num_blocks):
        key, k1, k2, k3 = jax.random.split(key, 4)
        w1 = jax.random.normal(k1, (embed_dim, embed_dim, 1, 1), jnp.float32)
        w1 = w1 * (1.0 / np.sqrt(embed_dim))
        w2 = jax.random.normal(
            k2, (embed_dim, embed_dim, kernel_size, kernel_size), jnp.float32)
        w2 = w2 * (1.0 / np.sqrt(embed_dim * kernel_size * kernel_size))
        w3 = jax.random.normal(k3, (embed_dim, embed_dim, 1, 1), jnp.float32)
        w3 = w3 * (1.0 / np.sqrt(embed_dim))
        params.append((w1, w2, w3))
    return params


if __name__ == "__main__":
    batch, embed_dim, H, W = 2, 8, 16, 16
    num_blocks = 2

    key = jax.random.PRNGKey(0)
    key_x, key_p = jax.random.split(key)
    x = jax.random.normal(key_x, (batch, embed_dim, H, W), jnp.float32)
    params = init_params(key_p, embed_dim, num_blocks)

    out = jax.block_until_ready(resnet2d_forward(x, params))
    ref = jax.block_until_ready(resnet2d_reference(x, params))
    np.testing.assert_allclose(np.asarray(out), np.asarray(ref),
                               rtol=2e-4, atol=2e-4)

    print("KERNEL_OK")
</pallas_src>

<mosaic_0001>
module attributes {stable_mosaic.version = 11 : i64} {
  func.func @_resnet2d_kernel(%arg0: i32, %arg1: memref<1x8x256xf32, #tpu.memory_space<vmem>>, %arg2: memref<2x8x8xf32, #tpu.memory_space<vmem>>, %arg3: memref<2x8x72xf32, #tpu.memory_space<vmem>>, %arg4: memref<2x8x8xf32, #tpu.memory_space<vmem>>, %arg5: memref<9x256xf32, #tpu.memory_space<vmem>>, %arg6: memref<1x8x256xf32, #tpu.memory_space<vmem>>) attributes {dimension_semantics = [#tpu.dimension_semantics<parallel>], iteration_bounds = array<i64: 2>, scalar_prefetch = 0 : i64, scratch_operands = 0 : i64, tpu.core_type = #tpu.core_type<tc>, window_params = [{transform_indices = @transform_0, window_bounds = array<i64: 1, 8, 256>}, {pipeline_mode = #tpu.pipeline_mode<synchronous>, transform_indices = @transform_1, window_bounds = array<i64: 2, 8, 8>}, {pipeline_mode = #tpu.pipeline_mode<synchronous>, transform_indices = @transform_2, window_bounds = array<i64: 2, 8, 72>}, {pipeline_mode = #tpu.pipeline_mode<synchronous>, transform_indices = @transform_3, window_bounds = array<i64: 2, 8, 8>}, {pipeline_mode = #tpu.pipeline_mode<synchronous>, transform_indices = @transform_4, window_bounds = array<i64: 9, 256>}, {transform_indices = @transform_5, window_bounds = array<i64: 1, 8, 256>}]} {
    %c0 = arith.constant 0 : index
    %c0_0 = arith.constant 0 : index
    %c0_1 = arith.constant 0 : index
    %0 = vector.load %arg1[%c0, %c0_0, %c0_1] : memref<1x8x256xf32, #tpu.memory_space<vmem>>, vector<1x8x256xf32>
    %1 = vector.shape_cast %0 : vector<1x8x256xf32> to vector<8x256xf32>
    %c0_2 = arith.constant 0 : index
    %c0_3 = arith.constant 0 : index
    %2 = vector.load %arg5[%c0_2, %c0_3] : memref<9x256xf32, #tpu.memory_space<vmem>>, vector<9x256xf32>
    %c0_i32 = arith.constant 0 : i32
    %3 = arith.index_cast %c0_i32 : i32 to index
    %c0_4 = arith.constant 0 : index
    %c0_5 = arith.constant 0 : index
    %4 = vector.load %arg2[%3, %c0_4, %c0_5] : memref<2x8x8xf32, #tpu.memory_space<vmem>>, vector<1x8x8xf32>
    %5 = vector.shape_cast %4 : vector<1x8x8xf32> to vector<8x8xf32>
    %cst = arith.constant dense<0.000000e+00> : vector<8x256xf32>
    %6 = tpu.matmul %5, %1, %cst {dimension_numbers = #tpu.dot_dimension_numbers<[1], [0], [0], [1], [0, 0, 1, 1], [], []>} : vector<8x8xf32>, vector<8x256xf32>, vector<8x256xf32> -> vector<8x256xf32>
    %cst_6 = arith.constant dense<0.000000e+00> : vector<8xf32>
    %7 = vector.multi_reduction <add>, %6, %cst_6 [1] : vector<8x256xf32> to vector<8xf32>
    %8 = vector.shape_cast %7 : vector<8xf32> to vector<8x1xf32>
    %cst_7 = arith.constant 2.560000e+02 : f32
    %9 = vector.broadcast %cst_7 : f32 to vector<8x1xf32>
    %10 = arith.divf %8, %9 : vector<8x1xf32>
    %11 = vector.broadcast %10 : vector<8x1xf32> to vector<8x256xf32>
    %12 = arith.subf %6, %11 : vector<8x256xf32>
    %13 = arith.mulf %12, %12 : vector<8x256xf32>
    %cst_8 = arith.constant dense<0.000000e+00> : vector<8xf32>
    %14 = vector.multi_reduction <add>, %13, %cst_8 [1] : vector<8x256xf32> to vector<8xf32>
    %15 = vector.shape_cast %14 : vector<8xf32> to vector<8x1xf32>
    %cst_9 = arith.constant 2.560000e+02 : f32
    %16 = vector.broadcast %cst_9 : f32 to vector<8x1xf32>
    %17 = arith.divf %15, %16 : vector<8x1xf32>
    %cst_10 = arith.constant 9.99999974E-6 : f32
    %18 = vector.broadcast %cst_10 : f32 to vector<8x1xf32>
    %19 = arith.addf %17, %18 : vector<8x1xf32>
    %20 = math.rsqrt %19 : vector<8x1xf32>
    %21 = vector.broadcast %20 : vector<8x1xf32> to vector<8x256xf32>
    %22 = arith.mulf %12, %21 : vector<8x256xf32>
    %cst_11 = arith.constant 0.000000e+00 : f32
    %23 = vector.broadcast %cst_11 : f32 to vector<8x256xf32>
    %24 = arith.maximumf %22, %23 : vector<8x256xf32>
    %c17_i32 = arith.constant 17 : i32
    %25 = tpu.dynamic_rotate %24 by %c17_i32 dim 1 : vector<8x256xf32>, i32 -> vector<8x256xf32>
    %26 = vector.extract_strided_slice %2 {offsets = [0, 0], sizes = [1, 256], strides = [1, 1]} : vector<9x256xf32> to vector<1x256xf32>
    %27 = vector.broadcast %26 : vector<1x256xf32> to vector<8x256xf32>
    %28 = arith.mulf %25, %27 : vector<8x256xf32>
    %c16_i32 = arith.constant 16 : i32
    %29 = tpu.dynamic_rotate %24 by %c16_i32 dim 1 : vector<8x256xf32>, i32 -> vector<8x256xf32>
    %30 = vector.extract_strided_slice %2 {offsets = [1, 0], sizes = [1, 256], strides = [1, 1]} : vector<9x256xf32> to vector<1x256xf32>
    %31 = vector.broadcast %30 : vector<1x256xf32> to vector<8x256xf32>
    %32 = arith.mulf %29, %31 : vector<8x256xf32>
    %c15_i32 = arith.constant 15 : i32
    %33 = tpu.dynamic_rotate %24 by %c15_i32 dim 1 : vector<8x256xf32>, i32 -> vector<8x256xf32>
    %34 = vector.extract_strided_slice %2 {offsets = [2, 0], sizes = [1, 256], strides = [1, 1]} : vector<9x256xf32> to vector<1x256xf32>
    %35 = vector.broadcast %34 : vector<1x256xf32> to vector<8x256xf32>
    %36 = arith.mulf %33, %35 : vector<8x256xf32>
    %c1_i32 = arith.constant 1 : i32
    %37 = tpu.dynamic_rotate %24 by %c1_i32 dim 1 : vector<8x256xf32>, i32 -> vector<8x256xf32>
    %38 = vector.extract_strided_slice %2 {offsets = [3, 0], sizes = [1, 256], strides = [1, 1]} : vector<9x256xf32> to vector<1x256xf32>
    %39 = vector.broadcast %38 : vector<1x256xf32> to vector<8x256xf32>
    %40 = arith.mulf %37, %39 : vector<8x256xf32>
    %c255_i32 = arith.constant 255 : i32
    %41 = tpu.dynamic_rotate %24 by %c255_i32 dim 1 : vector<8x256xf32>, i32 -> vector<8x256xf32>
    %42 = vector.extract_strided_slice %2 {offsets = [5, 0], sizes = [1, 256], strides = [1, 1]} : vector<9x256xf32> to vector<1x256xf32>
    %43 = vector.broadcast %42 : vector<1x256xf32> to vector<8x256xf32>
    %44 = arith.mulf %41, %43 : vector<8x256xf32>
    %c241_i32 = arith.constant 241 : i32
    %45 = tpu.dynamic_rotate %24 by %c241_i32 dim 1 : vector<8x256xf32>, i32 -> vector<8x256xf32>
    %46 = vector.extract_strided_slice %2 {offsets = [6, 0], sizes = [1, 256], strides = [1, 1]} : vector<9x256xf32> to vector<1x256xf32>
    %47 = vector.broadcast %46 : vector<1x256xf32> to vector<8x256xf32>
    %48 = arith.mulf %45, %47 : vector<8x256xf32>
    %c240_i32 = arith.constant 240 : i32
    %49 = tpu.dynamic_rotate %24 by %c240_i32 dim 1 : vector<8x256xf32>, i32 -> vector<8x256xf32>
    %50 = vector.extract_strided_slice %2 {offsets = [7, 0], sizes = [1, 256], strides = [1, 1]} : vector<9x256xf32> to vector<1x256xf32>
    %51 = vector.broadcast %50 : vector<1x256xf32> to vector<8x256xf32>
    %52 = arith.mulf %49, %51 : vector<8x256xf32>
    %c239_i32 = arith.constant 239 : i32
    %53 = tpu.dynamic_rotate %24 by %c239_i32 dim 1 : vector<8x256xf32>, i32 -> vector<8x256xf32>
    %54 = vector.extract_strided_slice %2 {offsets = [8, 0], sizes = [1, 256], strides = [1, 1]} : vector<9x256xf32> to vector<1x256xf32>
    %55 = vector.broadcast %54 : vector<1x256xf32> to vector<8x256xf32>
    %56 = arith.mulf %53, %55 : vector<8x256xf32>
    %57 = tpu.concatenate %28, %32, %36, %40, %24, %44, %48, %52, %56 in 0 : vector<8x256xf32>, vector<8x256xf32>, vector<8x256xf32>, vector<8x256xf32>, vector<8x256xf32>, vector<8x256xf32>, vector<8x256xf32>, vector<8x256xf32>, vector<8x256xf32> -> vector<72x256xf32>
    %58 = arith.index_cast %c0_i32 : i32 to index
    %c0_12 = arith.constant 0 : index
    %c0_13 = arith.constant 0 : index
    %59 = vector.load %arg3[%58, %c0_12, %c0_13] : memref<2x8x72xf32, #tpu.memory_space<vmem>>, vector<1x8x72xf32>
    %60 = vector.shape_cast %59 : vector<1x8x72xf32> to vector<8x72xf32>
    %cst_14 = arith.constant dense<0.000000e+00> : vector<8x256xf32>
    %61 = tpu.matmul %60, %57, %cst_14 {dimension_numbers = #tpu.dot_dimension_numbers<[1], [0], [0], [1], [0, 0, 1, 1], [], []>} : vector<8x72xf32>, vector<72x256xf32>, vector<8x256xf32> -> vector<8x256xf32>
    %cst_15 = arith.constant dense<0.000000e+00> : vector<8xf32>
    %62 = vector.multi_reduction <add>, %61, %cst_15 [1] : vector<8x256xf32> to vector<8xf32>
    %63 = vector.shape_cast %62 : vector<8xf32> to vector<8x1xf32>
    %cst_16 = arith.constant 2.560000e+02 : f32
    %64 = vector.broadcast %cst_16 : f32 to vector<8x1xf32>
    %65 = arith.divf %63, %64 : vector<8x1xf32>
    %66 = vector.broadcast %65 : vector<8x1xf32> to vector<8x256xf32>
    %67 = arith.subf %61, %66 : vector<8x256xf32>
    %68 = arith.mulf %67, %67 : vector<8x256xf32>
    %cst_17 = arith.constant dense<0.000000e+00> : vector<8xf32>
    %69 = vector.multi_reduction <add>, %68, %cst_17 [1] : vector<8x256xf32> to vector<8xf32>
    %70 = vector.shape_cast %69 : vector<8xf32> to vector<8x1xf32>
    %cst_18 = arith.constant 2.560000e+02 : f32
    %71 = vector.broadcast %cst_18 : f32 to vector<8x1xf32>
    %72 = arith.divf %70, %71 : vector<8x1xf32>
    %cst_19 = arith.constant 9.99999974E-6 : f32
    %73 = vector.broadcast %cst_19 : f32 to vector<8x1xf32>
    %74 = arith.addf %72, %73 : vector<8x1xf32>
    %75 = math.rsqrt %74 : vector<8x1xf32>
    %76 = vector.broadcast %75 : vector<8x1xf32> to vector<8x256xf32>
    %77 = arith.mulf %67, %76 : vector<8x256xf32>
    %cst_20 = arith.constant 0.000000e+00 : f32
    %78 = vector.broadcast %cst_20 : f32 to vector<8x256xf32>
    %79 = arith.maximumf %77, %78 : vector<8x256xf32>
    %80 = arith.index_cast %c0_i32 : i32 to index
    %c0_21 = arith.constant 0 : index
    %c0_22 = arith.constant 0 : index
    %81 = vector.load %arg4[%80, %c0_21, %c0_22] : memref<2x8x8xf32, #tpu.memory_space<vmem>>, vector<1x8x8xf32>
    %82 = vector.shape_cast %81 : vector<1x8x8xf32> to vector<8x8xf32>
    %cst_23 = arith.constant dense<0.000000e+00> : vector<8x256xf32>
    %83 = tpu.matmul %82, %79, %cst_23 {dimension_numbers = #tpu.dot_dimension_numbers<[1], [0], [0], [1], [0, 0, 1, 1], [], []>} : vector<8x8xf32>, vector<8x256xf32>, vector<8x256xf32> -> vector<8x256xf32>
    %cst_24 = arith.constant dense<0.000000e+00> : vector<8xf32>
    %84 = vector.multi_reduction <add>, %83, %cst_24 [1] : vector<8x256xf32> to vector<8xf32>
    %85 = vector.shape_cast %84 : vector<8xf32> to vector<8x1xf32>
    %cst_25 = arith.constant 2.560000e+02 : f32
    %86 = vector.broadcast %cst_25 : f32 to vector<8x1xf32>
    %87 = arith.divf %85, %86 : vector<8x1xf32>
    %88 = vector.broadcast %87 : vector<8x1xf32> to vector<8x256xf32>
    %89 = arith.subf %83, %88 : vector<8x256xf32>
    %90 = arith.mulf %89, %89 : vector<8x256xf32>
    %cst_26 = arith.constant dense<0.000000e+00> : vector<8xf32>
    %91 = vector.multi_reduction <add>, %90, %cst_26 [1] : vector<8x256xf32> to vector<8xf32>
    %92 = vector.shape_cast %91 : vector<8xf32> to vector<8x1xf32>
    %cst_27 = arith.constant 2.560000e+02 : f32
    %93 = vector.broadcast %cst_27 : f32 to vector<8x1xf32>
    %94 = arith.divf %92, %93 : vector<8x1xf32>
    %cst_28 = arith.constant 9.99999974E-6 : f32
    %95 = vector.broadcast %cst_28 : f32 to vector<8x1xf32>
    %96 = arith.addf %94, %95 : vector<8x1xf32>
    %97 = math.rsqrt %96 : vector<8x1xf32>
    %98 = vector.broadcast %97 : vector<8x1xf32> to vector<8x256xf32>
    %99 = arith.mulf %89, %98 : vector<8x256xf32>
    %cst_29 = arith.constant 0.000000e+00 : f32
    %100 = vector.broadcast %cst_29 : f32 to vector<8x256xf32>
    %101 = arith.maximumf %99, %100 : vector<8x256xf32>
    %102 = arith.addf %101, %1 : vector<8x256xf32>
    %c1_i32_30 = arith.constant 1 : i32
    %103 = arith.index_cast %c1_i32_30 : i32 to index
    %c0_31 = arith.constant 0 : index
    %c0_32 = arith.constant 0 : index
    %104 = vector.load %arg2[%103, %c0_31, %c0_32] : memref<2x8x8xf32, #tpu.memory_space<vmem>>, vector<1x8x8xf32>
    %105 = vector.shape_cast %104 : vector<1x8x8xf32> to vector<8x8xf32>
    %cst_33 = arith.constant dense<0.000000e+00> : vector<8x256xf32>
    %106 = tpu.matmul %105, %102, %cst_33 {dimension_numbers = #tpu.dot_dimension_numbers<[1], [0], [0], [1], [0, 0, 1, 1], [], []>} : vector<8x8xf32>, vector<8x256xf32>, vector<8x256xf32> -> vector<8x256xf32>
    %cst_34 = arith.constant dense<0.000000e+00> : vector<8xf32>
    %107 = vector.multi_reduction <add>, %106, %cst_34 [1] : vector<8x256xf32> to vector<8xf32>
    %108 = vector.shape_cast %107 : vector<8xf32> to vector<8x1xf32>
    %cst_35 = arith.constant 2.560000e+02 : f32
    %109 = vector.broadcast %cst_35 : f32 to vector<8x1xf32>
    %110 = arith.divf %108, %109 : vector<8x1xf32>
    %111 = vector.broadcast %110 : vector<8x1xf32> to vector<8x256xf32>
    %112 = arith.subf %106, %111 : vector<8x256xf32>
    %113 = arith.mulf %112, %112 : vector<8x256xf32>
    %cst_36 = arith.constant dense<0.000000e+00> : vector<8xf32>
    %114 = vector.multi_reduction <add>, %113, %cst_36 [1] : vector<8x256xf32> to vector<8xf32>
    %115 = vector.shape_cast %114 : vector<8xf32> to vector<8x1xf32>
    %cst_37 = arith.constant 2.560000e+02 : f32
    %116 = vector.broadcast %cst_37 : f32 to vector<8x1xf32>
    %117 = arith.divf %115, %116 : vector<8x1xf32>
    %cst_38 = arith.constant 9.99999974E-6 : f32
    %118 = vector.broadcast %cst_38 : f32 to vector<8x1xf32>
    %119 = arith.addf %117, %118 : vector<8x1xf32>
    %120 = math.rsqrt %119 : vector<8x1xf32>
    %121 = vector.broadcast %120 : vector<8x1xf32> to vector<8x256xf32>
    %122 = arith.mulf %112, %121 : vector<8x256xf32>
    %cst_39 = arith.constant 0.000000e+00 : f32
    %123 = vector.broadcast %cst_39 : f32 to vector<8x256xf32>
    %124 = arith.maximumf %122, %123 : vector<8x256xf32>
    %c17_i32_40 = arith.constant 17 : i32
    %125 = tpu.dynamic_rotate %124 by %c17_i32_40 dim 1 : vector<8x256xf32>, i32 -> vector<8x256xf32>
    %126 = vector.extract_strided_slice %2 {offsets = [0, 0], sizes = [1, 256], strides = [1, 1]} : vector<9x256xf32> to vector<1x256xf32>
    %127 = vector.broadcast %126 : vector<1x256xf32> to vector<8x256xf32>
    %128 = arith.mulf %125, %127 : vector<8x256xf32>
    %c16_i32_41 = arith.constant 16 : i32
    %129 = tpu.dynamic_rotate %124 by %c16_i32_41 dim 1 : vector<8x256xf32>, i32 -> vector<8x256xf32>
    %130 = vector.extract_strided_slice %2 {offsets = [1, 0], sizes = [1, 256], strides = [1, 1]} : vector<9x256xf32> to vector<1x256xf32>
    %131 = vector.broadcast %130 : vector<1x256xf32> to vector<8x256xf32>
    %132 = arith.mulf %129, %131 : vector<8x256xf32>
    %c15_i32_42 = arith.constant 15 : i32
    %133 = tpu.dynamic_rotate %124 by %c15_i32_42 dim 1 : vector<8x256xf32>, i32 -> vector<8x256xf32>
    %134 = vector.extract_strided_slice %2 {offsets = [2, 0], sizes = [1, 256], strides = [1, 1]} : vector<9x256xf32> to vector<1x256xf32>
    %135 = vector.broadcast %134 : vector<1x256xf32> to vector<8x256xf32>
    %136 = arith.mulf %133, %135 : vector<8x256xf32>
    %c1_i32_43 = arith.constant 1 : i32
    %137 = tpu.dynamic_rotate %124 by %c1_i32_43 dim 1 : vector<8x256xf32>, i32 -> vector<8x256xf32>
    %138 = vector.extract_strided_slice %2 {offsets = [3, 0], sizes = [1, 256], strides = [1, 1]} : vector<9x256xf32> to vector<1x256xf32>
    %139 = vector.broadcast %138 : vector<1x256xf32> to vector<8x256xf32>
    %140 = arith.mulf %137, %139 : vector<8x256xf32>
    %c255_i32_44 = arith.constant 255 : i32
    %141 = tpu.dynamic_rotate %124 by %c255_i32_44 dim 1 : vector<8x256xf32>, i32 -> vector<8x256xf32>
    %142 = vector.extract_strided_slice %2 {offsets = [5, 0], sizes = [1, 256], strides = [1, 1]} : vector<9x256xf32> to vector<1x256xf32>
    %143 = vector.broadcast %142 : vector<1x256xf32> to vector<8x256xf32>
    %144 = arith.mulf %141, %143 : vector<8x256xf32>
    %c241_i32_45 = arith.constant 241 : i32
    %145 = tpu.dynamic_rotate %124 by %c241_i32_45 dim 1 : vector<8x256xf32>, i32 -> vector<8x256xf32>
    %146 = vector.extract_strided_slice %2 {offsets = [6, 0], sizes = [1, 256], strides = [1, 1]} : vector<9x256xf32> to vector<1x256xf32>
    %147 = vector.broadcast %146 : vector<1x256xf32> to vector<8x256xf32>
    %148 = arith.mulf %145, %147 : vector<8x256xf32>
    %c240_i32_46 = arith.constant 240 : i32
    %149 = tpu.dynamic_rotate %124 by %c240_i32_46 dim 1 : vector<8x256xf32>, i32 -> vector<8x256xf32>
    %150 = vector.extract_strided_slice %2 {offsets = [7, 0], sizes = [1, 256], strides = [1, 1]} : vector<9x256xf32> to vector<1x256xf32>
    %151 = vector.broadcast %150 : vector<1x256xf32> to vector<8x256xf32>
    %152 = arith.mulf %149, %151 : vector<8x256xf32>
    %c239_i32_47 = arith.constant 239 : i32
    %153 = tpu.dynamic_rotate %124 by %c239_i32_47 dim 1 : vector<8x256xf32>, i32 -> vector<8x256xf32>
    %154 = vector.extract_strided_slice %2 {offsets = [8, 0], sizes = [1, 256], strides = [1, 1]} : vector<9x256xf32> to vector<1x256xf32>
    %155 = vector.broadcast %154 : vector<1x256xf32> to vector<8x256xf32>
    %156 = arith.mulf %153, %155 : vector<8x256xf32>
    %157 = tpu.concatenate %128, %132, %136, %140, %124, %144, %148, %152, %156 in 0 : vector<8x256xf32>, vector<8x256xf32>, vector<8x256xf32>, vector<8x256xf32>, vector<8x256xf32>, vector<8x256xf32>, vector<8x256xf32>, vector<8x256xf32>, vector<8x256xf32> -> vector<72x256xf32>
    %158 = arith.index_cast %c1_i32_30 : i32 to index
    %c0_48 = arith.constant 0 : index
    %c0_49 = arith.constant 0 : index
    %159 = vector.load %arg3[%158, %c0_48, %c0_49] : memref<2x8x72xf32, #tpu.memory_space<vmem>>, vector<1x8x72xf32>
    %160 = vector.shape_cast %159 : vector<1x8x72xf32> to vector<8x72xf32>
    %cst_50 = arith.constant dense<0.000000e+00> : vector<8x256xf32>
    %161 = tpu.matmul %160, %157, %cst_50 {dimension_numbers = #tpu.dot_dimension_numbers<[1], [0], [0], [1], [0, 0, 1, 1], [], []>} : vector<8x72xf32>, vector<72x256xf32>, vector<8x256xf32> -> vector<8x256xf32>
    %cst_51 = arith.constant dense<0.000000e+00> : vector<8xf32>
    %162 = vector.multi_reduction <add>, %161, %cst_51 [1] : vector<8x256xf32> to vector<8xf32>
    %163 = vector.shape_cast %162 : vector<8xf32> to vector<8x1xf32>
    %cst_52 = arith.constant 2.560000e+02 : f32
    %164 = vector.broadcast %cst_52 : f32 to vector<8x1xf32>
    %165 = arith.divf %163, %164 : vector<8x1xf32>
    %166 = vector.broadcast %165 : vector<8x1xf32> to vector<8x256xf32>
    %167 = arith.subf %161, %166 : vector<8x256xf32>
    %168 = arith.mulf %167, %167 : vector<8x256xf32>
    %cst_53 = arith.constant dense<0.000000e+00> : vector<8xf32>
    %169 = vector.multi_reduction <add>, %168, %cst_53 [1] : vector<8x256xf32> to vector<8xf32>
    %170 = vector.shape_cast %169 : vector<8xf32> to vector<8x1xf32>
    %cst_54 = arith.constant 2.560000e+02 : f32
    %171 = vector.broadcast %cst_54 : f32 to vector<8x1xf32>
    %172 = arith.divf %170, %171 : vector<8x1xf32>
    %cst_55 = arith.constant 9.99999974E-6 : f32
    %173 = vector.broadcast %cst_55 : f32 to vector<8x1xf32>
    %174 = arith.addf %172, %173 : vector<8x1xf32>
    %175 = math.rsqrt %174 : vector<8x1xf32>
    %176 = vector.broadcast %175 : vector<8x1xf32> to vector<8x256xf32>
    %177 = arith.mulf %167, %176 : vector<8x256xf32>
    %cst_56 = arith.constant 0.000000e+00 : f32
    %178 = vector.broadcast %cst_56 : f32 to vector<8x256xf32>
    %179 = arith.maximumf %177, %178 : vector<8x256xf32>
    %180 = arith.index_cast %c1_i32_30 : i32 to index
    %c0_57 = arith.constant 0 : index
    %c0_58 = arith.constant 0 : index
    %181 = vector.load %arg4[%180, %c0_57, %c0_58] : memref<2x8x8xf32, #tpu.memory_space<vmem>>, vector<1x8x8xf32>
    %182 = vector.shape_cast %181 : vector<1x8x8xf32> to vector<8x8xf32>
    %cst_59 = arith.constant dense<0.000000e+00> : vector<8x256xf32>
    %183 = tpu.matmul %182, %179, %cst_59 {dimension_numbers = #tpu.dot_dimension_numbers<[1], [0], [0], [1], [0, 0, 1, 1], [], []>} : vector<8x8xf32>, vector<8x256xf32>, vector<8x256xf32> -> vector<8x256xf32>
    %cst_60 = arith.constant dense<0.000000e+00> : vector<8xf32>
    %184 = vector.multi_reduction <add>, %183, %cst_60 [1] : vector<8x256xf32> to vector<8xf32>
    %185 = vector.shape_cast %184 : vector<8xf32> to vector<8x1xf32>
    %cst_61 = arith.constant 2.560000e+02 : f32
    %186 = vector.broadcast %cst_61 : f32 to vector<8x1xf32>
    %187 = arith.divf %185, %186 : vector<8x1xf32>
    %188 = vector.broadcast %187 : vector<8x1xf32> to vector<8x256xf32>
    %189 = arith.subf %183, %188 : vector<8x256xf32>
    %190 = arith.mulf %189, %189 : vector<8x256xf32>
    %cst_62 = arith.constant dense<0.000000e+00> : vector<8xf32>
    %191 = vector.multi_reduction <add>, %190, %cst_62 [1] : vector<8x256xf32> to vector<8xf32>
    %192 = vector.shape_cast %191 : vector<8xf32> to vector<8x1xf32>
    %cst_63 = arith.constant 2.560000e+02 : f32
    %193 = vector.broadcast %cst_63 : f32 to vector<8x1xf32>
    %194 = arith.divf %192, %193 : vector<8x1xf32>
    %cst_64 = arith.constant 9.99999974E-6 : f32
    %195 = vector.broadcast %cst_64 : f32 to vector<8x1xf32>
    %196 = arith.addf %194, %195 : vector<8x1xf32>
    %197 = math.rsqrt %196 : vector<8x1xf32>
    %198 = vector.broadcast %197 : vector<8x1xf32> to vector<8x256xf32>
    %199 = arith.mulf %189, %198 : vector<8x256xf32>
    %cst_65 = arith.constant 0.000000e+00 : f32
    %200 = vector.broadcast %cst_65 : f32 to vector<8x256xf32>
    %201 = arith.maximumf %199, %200 : vector<8x256xf32>
    %202 = arith.addf %201, %102 : vector<8x256xf32>
    %c2_i32 = arith.constant 2 : i32
    %c0_66 = arith.constant 0 : index
    %c0_67 = arith.constant 0 : index
    %c0_68 = arith.constant 0 : index
    %203 = vector.load %arg6[%c0_66, %c0_67, %c0_68] : memref<1x8x256xf32, #tpu.memory_space<vmem>>, vector<1x8x256xf32>
    %204 = vector.shape_cast %203 : vector<1x8x256xf32> to vector<8x256xf32>
    %205 = vector.shape_cast %202 : vector<8x256xf32> to vector<1x8x256xf32>
    tpu.vector_store %arg6[%c0_66, %c0_67, %c0_68], %205 {strides = array<i32>} : memref<1x8x256xf32, #tpu.memory_space<vmem>>, vector<1x8x256xf32>,
    return
  }
  func.func @transform_0(%arg0: i32) -> (i32, i32, i32) {
    %c0_i32 = arith.constant 0 : i32
    %c0_i32_0 = arith.constant 0 : i32
    %c0_i32_1 = arith.constant 0 : i32
    return %arg0, %c0_i32, %c0_i32_0 : i32, i32, i32
  }
  func.func @transform_1(%arg0: i32) -> (i32, i32, i32) {
    %c0_i32 = arith.constant 0 : i32
    %c0_i32_0 = arith.constant 0 : i32
    %c0_i32_1 = arith.constant 0 : i32
    %c0_i32_2 = arith.constant 0 : i32
    return %c0_i32, %c0_i32_0, %c0_i32_1 : i32, i32, i32
  }
  func.func @transform_2(%arg0: i32) -> (i32, i32, i32) {
    %c0_i32 = arith.constant 0 : i32
    %c0_i32_0 = arith.constant 0 : i32
    %c0_i32_1 = arith.constant 0 : i32
    %c0_i32_2 = arith.constant 0 : i32
    return %c0_i32, %c0_i32_0, %c0_i32_1 : i32, i32, i32
  }
  func.func @transform_3(%arg0: i32) -> (i32, i32, i32) {
    %c0_i32 = arith.constant 0 : i32
    %c0_i32_0 = arith.constant 0 : i32
    %c0_i32_1 = arith.constant 0 : i32
    %c0_i32_2 = arith.constant 0 : i32
    return %c0_i32, %c0_i32_0, %c0_i32_1 : i32, i32, i32
  }
  func.func @transform_4(%arg0: i32) -> (i32, i32) {
    %c0_i32 = arith.constant 0 : i32
    %c0_i32_0 = arith.constant 0 : i32
    %c0_i32_1 = arith.constant 0 : i32
    return %c0_i32, %c0_i32_0 : i32, i32
  }
  func.func @transform_5(%arg0: i32) -> (i32, i32, i32) {
    %c0_i32 = arith.constant 0 : i32
    %c0_i32_0 = arith.constant 0 : i32
    %c0_i32_1 = arith.constant 0 : i32
    return %arg0, %c0_i32, %c0_i32_0 : i32, i32, i32
  }
}

</mosaic_0001>

<bundles_post_ra>
// kernel: tpu_custom_call.1
= control target key start
LH: loop header
LB: loop body
LE: loop exit
PB: predicated region body
PF: predicated region fallthrough
CT: control target
= control target key end

     0   :  { %10 = vsyncpa [#allocation3], 0  ;;  %s2194_s0 = inlined_call_operand.hbm [shape: f32[2,8,256], index: 0, kind: input, shape index: {}]   ;;  %s2195_s1 = inlined_call_operand.hbm [shape: f32[2,8,8], index: 1, kind: input, shape index: {}]   ;;  %s2196_s2 = inlined_call_operand.hbm [shape: f32[2,8,72], index: 2, kind: input, shape index: {}]   ;;  %s2197_s3 = inlined_call_operand.hbm [shape: f32[2,8,8], index: 3, kind: input, shape index: {}]   ;;  %s2198_s4 = inlined_call_operand.hbm [shape: f32[9,256], index: 4, kind: input, shape index: {}]   ;;  %s2199_s5 = inlined_call_operand.hbm [shape: f32[2,8,256], index: 5, kind: output, shape index: {}]  }
   0x1   :  { %12 = vsyncpa [#allocation3 + $0x1], 0 }
   0x2   :  { %13 = vsyncpa [#allocation6], 0 }
   0x3   :  { %14 = vsyncpa [#allocation9], 0 }
   0x4   :  { %15 = vsyncpa [#allocation4], 0 }
   0x5   :  { %17 = vsyncpa [#allocation4 + $0x1], 0  ;;  %s1643_s18 = smov 0   ;;  %s1645_s19 = smov 0  }
   0x6   :  { %s1647_s20 = smov 0   ;;  %s1649_s21 = smov 0  }
   0x7 LB: > { %s1594_s22 = smov [#allocation5]   ;;  %s1664_s24 = sadd.s32 4294967295, %s1592_s21   ;;  %s1592_s21 = sphi %s1649_s21, %s2223_s21   ;;  %s1588_s20 = sphi %s1647_s20, %s2222_s20   ;;  %s1584_s19 = sphi %s1645_s19, %s2221_s19   ;;  %s1580_s18 = sphi %s1643_s18, %s2220_s18  }
   0x8   : > { %s176_s23 = sshll.u32 %s1594_s22, 4  ;;  %p1201_p0 = scmp.ge.s32.totalorder %s1592_s21, 1  ;;  %s1669_s23 = int_to_ptr.vmem [resolvable:$true] %s176_s23 }
   0x9   : > { %p2200_p1 = scmp.eq.s32.totalorder %s1664_s24, 0  ;;  %p164_p2 = scmp.lt.s32.totalorder %s1592_s21, 3 }
   0xa   : > { %s1595_s26 = smov [#allocation8]   ;;  %s1596_s29 = smov [#allocation7]  }
   0xb   : > { %p1671_p3 = pnand %p1201_p0, %p164_p2  ;;  %s202_s27 = sshll.u32 %s1595_s26, 4  ;;  %s1684_s27 = int_to_ptr.vmem [resolvable:$true] %s202_s27 }
   0xc   : > { %s189_s30 = sshll.u32 %s1596_s29, 4  ;;  %s1376_s8 = scalar_lea.hbm %s2195_s1, 256  ;;  %s1686_s30 = int_to_ptr.vmem [resolvable:$true] %s189_s30 }
   0xd   : > { %s2203_s25 = scalar_select %p1671_p3, 1, 0 }
   0xe   : > { %p1284_p5 = pneg %p1671_p3  ;;  %p1377_p7 = scmp.ne.s32.totalorder %s2195_s1, %s1376_s8 }
   0xf   : > { %p1383_p11 = scmp.lt.u32.totalorder %s1376_s8, %s2195_s1 }
  0x10   : > { %p1680_p6 = pnand %p1284_p5, %p2200_p1 }
  0x12   : > { %p1696_p8 = pneg %p1680_p6 }
  0x14   : > { %p1379_p9 = pnand %p1696_p8, %p1377_p7 }
  0x16   : > { %p1380_p10 = pneg %p1379_p9 }
  0x18   : > { %p1385_p12 = pnand %p1383_p11, %p1380_p10 }
  0x1a   : > { %1388 = shalt.err (!%p1385_p12)
}
  0x1b   : > { %s1389_s14 = scalar_lea.vmem %s1669_s23, 256  ;;  %p1397_p5 = scmp.lt.s32.totalorder %s1669_s23, %s1669_s23 }
  0x1c   : > { %p1390_p13 = scmp.ne.s32.totalorder %s1669_s23, %s1389_s14  ;;  %p1398_p4 = scmp.lt.s32.totalorder %s1389_s14, %s1389_s14 }
  0x1e   : > { %p1392_p0 = pnand %p1390_p13, %p1696_p8  ;;  %p1399_p7 = por %p1398_p4, %p1397_p5 }
  0x20   : > { %p1393_p2 = pneg %p1392_p0 }
  0x22   : > { %p1400_p9 = pnand %p1399_p7, %p1393_p2 }
  0x24   : > { %1403 = shalt.err (!%p1400_p9)
}
  0x25   : > { %s1597_s15 = smov 128   ;;  %s1598_s16 = smov 8  }
  0x26   : > { %1287 = dma.hbm_to_vmem [thread:$0]  (!%p1680_p6), %s2195_s1, 256, %s1669_s23, [#allocation6], %s1597_s15, %s1597_s15, %s1598_s16  }
  0x27   : > { %s1404_s6 = scalar_lea.hbm %s2197_s3, 256 }
  0x28   : > { %p1405_p4 = scmp.ne.s32.totalorder %s2197_s3, %s1404_s6  ;;  %p1411_p12 = scmp.lt.u32.totalorder %s1404_s6, %s2197_s3 }
  0x2a   : > { %p1407_p10 = pnand %p1405_p4, %p1696_p8 }
  0x2c   : > { %p1408_p11 = pneg %p1407_p10 }
  0x2e   : > { %p1413_p13 = pnand %p1411_p12, %p1408_p11 }
  0x30   : > { %1416 = shalt.err (!%p1413_p13)
}
  0x31   : > { %s1417_s23 = scalar_lea.vmem %s1684_s27, 256  ;;  %p1425_p7 = scmp.lt.s32.totalorder %s1684_s27, %s1684_s27 }
  0x32   : > { %p1418_p0 = scmp.ne.s32.totalorder %s1684_s27, %s1417_s23  ;;  %p1426_p9 = scmp.lt.s32.totalorder %s1417_s23, %s1417_s23 }
  0x34   : > { %p1420_p2 = pnand %p1418_p0, %p1696_p8  ;;  %p1427_p4 = por %p1426_p9, %p1425_p7 }
  0x36   : > { %p1421_p5 = pneg %p1420_p2 }
  0x38   : > { %p1428_p10 = pnand %p1427_p4, %p1421_p5 }
  0x3a   : > { %1431 = shalt.err (!%p1428_p10)
}
  0x3b   : > { %1293 = dma.hbm_to_vmem [thread:$0]  (!%p1680_p6), %s2197_s3, 256, %s1684_s27, [#allocation9], %s1597_s15, %s1597_s15, %s1598_s16  }
  0x3c   : > { %s1432_s22 = scalar_lea.hbm %s2196_s2, 256 }
  0x3d   : > { %p1433_p11 = scmp.ne.s32.totalorder %s2196_s2, %s1432_s22  ;;  %p1439_p0 = scmp.lt.u32.totalorder %s1432_s22, %s2196_s2 }
  0x3f   : > { %p1435_p12 = pnand %p1433_p11, %p1696_p8 }
  0x41   : > { %p1436_p13 = pneg %p1435_p12 }
  0x43   : > { %p1441_p2 = pnand %p1439_p0, %p1436_p13 }
  0x45   : > { %1444 = shalt.err (!%p1441_p2)
}
  0x46   : > { %s1445_s27 = scalar_lea.vmem %s1686_s30, 256  ;;  %p1453_p4 = scmp.lt.s32.totalorder %s1686_s30, %s1686_s30 }
  0x47   : > { %p1446_p5 = scmp.ne.s32.totalorder %s1686_s30, %s1445_s27  ;;  %p1454_p10 = scmp.lt.s32.totalorder %s1445_s27, %s1445_s27 }
  0x49   : > { %p1448_p7 = pnand %p1446_p5, %p1696_p8  ;;  %p1455_p11 = por %p1454_p10, %p1453_p4 }
  0x4b   : > { %p1449_p9 = pneg %p1448_p7 }
  0x4d   : > { %p1456_p12 = pnand %p1455_p11, %p1449_p9 }
  0x4f   : > { %1459 = shalt.err (!%p1456_p12)
}
  0x50   : > { %1290 = dma.hbm_to_vmem [thread:$0]  (!%p1680_p6), %s2196_s2, 256, %s1686_s30, [#allocation6], %s1597_s15, %s1597_s15, %s1598_s16  }
  0x51   : > { %s1599_s10 = smov [#allocation10]   ;;  %s1460_s14 = scalar_lea.hbm %s2198_s4, 512 }
  0x52   : > { %s215_s23 = sshll.u32 %s1599_s10, 4  ;;  %p1461_p13 = scmp.ne.s32.totalorder %s2198_s4, %s1460_s14  ;;  %s216_s23 = int_to_ptr.vmem [resolvable:$true] %s215_s23 }
  0x53   : > { %p1467_p5 = scmp.lt.u32.totalorder %s1460_s14, %s2198_s4 }
  0x54   : > { %p1463_p0 = pnand %p1461_p13, %p1696_p8 }
  0x56   : > { %p1464_p2 = pneg %p1463_p0 }
  0x58   : > { %p1469_p7 = pnand %p1467_p5, %p1464_p2 }
  0x5a   : > { %1472 = shalt.err (!%p1469_p7)
}
  0x5b   : > { %s1473_s30 = scalar_lea.vmem %s216_s23, 512  ;;  %p1481_p11 = scmp.lt.s32.totalorder %s216_s23, %s216_s23 }
  0x5c   : > { %p1474_p9 = scmp.ne.s32.totalorder %s216_s23, %s1473_s30  ;;  %p1482_p12 = scmp.lt.s32.totalorder %s1473_s30, %s1473_s30 }
  0x5e   : > { %p1476_p4 = pnand %p1474_p9, %p1696_p8  ;;  %p1483_p1 = por %p1482_p12, %p1481_p11 }
  0x60   : > { %p1477_p10 = pneg %p1476_p4 }
  0x62   : > { %p1484_p3 = pnand %p1483_p1, %p1477_p10 }
  0x64   : > { %1487 = shalt.err (!%p1484_p3)
}
  0x65   : > { %s1600_s15 = smov 256   ;;  %s1601_s11 = smov 16  }
  0x66   : > { %1296 = dma.hbm_to_vmem [thread:$0]  (!%p1680_p6), %s2198_s4, 512, %s216_s23, [#allocation9], %s1600_s15, %s1600_s15, %s1601_s11  }
  0x67   : > { %s1200_s7 = sadd.s32 4294967294, %s1592_s21   ;;  %s1792_s27 = sadd.s32 1, %s1592_s21  }
  0x68   : > { %s27_s8 = ssub.s32 %s1592_s21, %s1792_s27  ;;  %s30_s9 = sadd.s32 1, %s1588_s20 }
  0x69   : > { %p28_p1 = scmp.eq.s32.totalorder %s27_s8, 0  ;;  %p37_p3 = scmp.ne.s32.totalorder %s1588_s20, %s1584_s19 }
  0x6a   : > { %p38_p8 = scmp.eq.s32.totalorder %s1592_s21, 0  ;;  %p43_p13 = scmp.ne.s32.totalorder %s1584_s19, %s1580_s18 }
  0x6b   : > { %s1803_s10 = scalar_select %p28_p1, %s1588_s20, %s30_s9  }
  0x6c   : > { %p1805_p0 = por %p38_p8, %p37_p3  ;;  %p2207_p2 = scmp.eq.s32.totalorder %s1664_s24, 0 }
  0x6d   : > { %p151_p5 = scmp.eq.s32.totalorder %s1664_s24, 1  ;;  %p157_p7 = scmp.eq.s32.totalorder %s1200_s7, 1 }
  0x6e   : > { %p1811_p6 = por %p2207_p2, %p43_p13  ;;  %p1309_p9 = scmp.lt.s32.totalorder %s1592_s21, 2 }
  0x6f   : > { %s229_s12 = sand.u32 1, %s1588_s20   ;;  %p1818_p4 = por %p151_p5, %p37_p3 }
  0x70   : > { %p1822_p10 = por %p157_p7, %p43_p13  ;;  %s1207_s17 = sshll.u32 %s229_s12, 4 }
  0x71   : > { %s2209_s13 = scalar_select %p1818_p4, 1, 0 }
  0x72   : > { %s2210_s14 = scalar_select %p1822_p10, 1, 0 }
  0x73   : > { %s1230_s22 = sshll.u32 %s1592_s21, 8  ;;  %s233_s15 = scalar_lea.vmem [#allocation2], %s1207_s17 }
  0x74   : > { %s1830_s30 = scalar_lea.hbm %s2194_s0, %s1230_s22  ;;  %s241_s11 = sshll.u32 %s233_s15, 4  ;;  %s1832_s11 = int_to_ptr.vmem [resolvable:$true] %s241_s11 }
  0x75   : > { %p1836_p11 = pnand %p1309_p9, %p1805_p0  ;;  %s230_s6 = scalar_lea.sflag [#allocation3], %s229_s12 }
  0x76   : > { %s1488_s7 = scalar_lea.hbm %s1830_s30, 256  ;;  %s1493_s17 = scalar_lea.hbm %s2194_s0, 512 }
  0x77   : > { %p1489_p12 = scmp.ne.s32.totalorder %s1830_s30, %s1488_s7  ;;  %p1490_p1 = pneg %p1836_p11 }
  0x78   : > { %p1494_p13 = scmp.lt.u32.totalorder %s1830_s30, %s2194_s0  ;;  %p1495_p0 = scmp.lt.u32.totalorder %s1493_s17, %s1488_s7 }
  0x79   : > { %p1491_p3 = pnand %p1490_p1, %p1489_p12  ;;  %p1497_p5 = scmp.lt.u32.totalorder %s1488_s7, %s1830_s30 }
  0x7a   : > { %p1496_p2 = por %p1495_p0, %p1494_p13 }
  0x7b   : > { %p1492_p8 = pneg %p1491_p3 }
  0x7c   : > { %p1498_p7 = por %p1497_p5, %p1496_p2 }
  0x7e   : > { %p1499_p9 = pnand %p1498_p7, %p1492_p8 }
  0x80   : > { %1502 = shalt.err (!%p1499_p9)
}
  0x81   : > { %s1503_s12 = scalar_lea.vmem %s1832_s11, 256  ;;  %s1602_s26 = smov [#allocation2]  }
  0x82   : > { %p1504_p12 = scmp.ne.s32.totalorder %s1832_s11, %s1503_s12  ;;  %s1508_s29 = sshll.u32 %s1602_s26, 4  ;;  %s1509_s29 = int_to_ptr.vmem [resolvable:$false] %s1508_s29 }
  0x83   : > { %s1510_s15 = scalar_lea.vmem %s1509_s29, 512  ;;  %p1511_p4 = scmp.lt.s32.totalorder %s1832_s11, %s1509_s29 }
  0x84   : > { %p1506_p3 = pnand %p1504_p12, %p1490_p1  ;;  %p1512_p13 = scmp.lt.s32.totalorder %s1510_s15, %s1503_s12 }
  0x86   : > { %p1507_p10 = pneg %p1506_p3  ;;  %p1513_p0 = por %p1512_p13, %p1511_p4 }
  0x88   : > { %p1514_p2 = pnand %p1513_p0, %p1507_p10 }
  0x8a   : > { %1517 = shalt.err (!%p1514_p2)
}
  0x8b   : > { %1300 = dma.hbm_to_vmem [thread:$0]  (!%p1836_p11), %s1830_s30, 256, %s1832_s11, %s230_s6  }
  0x8c   : > { %p2212_p8 = scmp.ne.s32.totalorder %s2203_s25, 0 }
  0x8d   : > { %s1868_s7 = sand.u32 (!%p2212_p8), 1, %s1584_s19  }
  0x8e   : > { %250 = sbr.rel (%p2212_p8) target bundleno = 3652 (0xe44), region = 40  ;;  %s1211_s8 = sshll.u32 (!%p2212_p8), %s1868_s7, 4 }
  0x8f   : > { %s253_s9 = scalar_lea.sflag (!%p2212_p8), [#allocation3], %s1868_s7  ;;  %s256_s17 = scalar_lea.vmem (!%p2212_p8), [#allocation2], %s1211_s8 }
  0x95   : > { %1563 = dma.done.wait (%p1811_p6), %s253_s9, 256  }
  0x96   : > { %1565 = vsyncadd (%p1811_p6), %s253_s9, 4294967040  ;;  %p2213_p4 = scmp.eq.s32.totalorder %s1664_s24, 0 }
  0x98   : > { %1567 = dma.done.wait (%p2213_p4), [#allocation6], 512   ;;  %p2214_p10 = pmov %p2213_p4 }
  0x99   : > { %p2215_p11 = pmov %p2213_p4 }
  0x9a   : > { %1569 = vsyncadd (%p2214_p10), [#allocation6], 4294966784 }
  0x9b   : > { %1571 = dma.done.wait (%p2215_p11), [#allocation9], 768   ;;  %p2216_p1 = pmov %p2213_p4 }
  0x9c   : > { %v1603_v0 = vmov 0.0   ;;  %v1888_v1 = vld [vmem:[%s256_s17 + $0x8] sm:$0xff]  ;;  %v1890_v2 = vld [vmem:[%s256_s17] sm:$0xff]  ;;  %vm306_vm0 = vcmask 64512   ;;  %s1604_s25 = smov 16   ;;  %s1605_s23 = smov 17   ;;  %v404_v22 = vlaneseq }
  0x9d   : > { %1573 = vsyncadd (%p2216_p1), [#allocation9], 4294966528  ;;  %374 = vmatprep.mubr.f32.mxu1 %v1603_v0  ;;  %700 = vmatprep.mubr.f32.mxu0 %v1603_v0  ;;  %v305_v3 = vld [vmem:[#allocation5] sm:$0xff]  ;;  %s1606_s30 = smov 127   ;;  %s1607_s11 = smov 113   ;;  %v1937_v27 = vld [vmem:[#allocation10] sm:$0xff] }
  0x9e   : > { %310 = vmatprep.subr.mxu1 %v1888_v1  ;;  %s1608_s16 = smov 112   ;;  %s1609_s6 = smov 15   ;;  %v1932_v23 = vshrl.u32 %v404_v22, 7  ;;  %v1934_v25 = vand.u32 127, %v404_v22  ;;  %v1940_v29 = vld [vmem:[#allocation10 + $0x8] sm:$0xff]  ;;  %vm539_vm9 = vcmask 588800  }
  0x9f   : > { %311 = vmatpush1.msra.mxu1 %v1890_v2  ;;  %s1610_s28 = smov 111   ;;  %s1611_s22 = smov 1  }
  0xa0   : > { %1217 = vmatmul.mubr.msk.f32.vlgmr.msra.gmra.mrb[0].mxu1 %vm306_vm0, %v305_v3  ;;  %v411_v26 = vsub.s32 0, %v1932_v23  ;;  %v428_v28 = vsub.s32 1, %v1932_v23  ;;  %vm406_vm1 = vcmp.lt.s32.totalorder %v1934_v25, 17  ;;  %vm423_vm2 = vcmp.lt.s32.totalorder %v1934_v25, 16  ;;  %s1231_s12 = sshll.u32 %s1664_s24, 8  ;;  %s298_s26 = scalar_lea.vmem [#allocation11], %s1211_s8 }
  0xa1   : > { %607 = vmatprep.mubr.f32.mxu1 %v1603_v0  ;;  %v445_v49 = vsub.s32 2, %v1932_v23  ;;  %v462_v50 = vsub.s32 3, %v1932_v23  ;;  %vm440_vm3 = vcmp.lt.s32.totalorder %v1934_v25, 15  ;;  %v479_v53 = vsub.s32 5, %v1932_v23  ;;  %s1092_s29 = sshll.u32 %s298_s26, 4  ;;  %s2150_s17 = scalar_lea.hbm %s2199_s5, %s1231_s12  ;;  %s2152_s29 = int_to_ptr.vmem [resolvable:$true] %s1092_s29 }
  0xa2   : > { %v1944_v31 = vrot.slane %v1937_v27, %v411_v26  ;;  %v1947_v32 = vrot.slane %v1940_v29, %v411_v26  ;;  %v1951_v33 = vrot.slane %v1937_v27, %v428_v28  ;;  %v1954_v34 = vrot.slane %v1940_v29, %v428_v28  ;;  %s1078_s24 = scalar_lea.sflag [#allocation4], %s1868_s7  ;;  %s1518_s8 = scalar_lea.vmem %s2152_s29, 256 }
  0xa3   : > { %v1972_v52 = vrot.slane %v1937_v27, %v445_v49  ;;  %v1976_v55 = vrot.slane %v1940_v29, %v445_v49  ;;  %vm457_vm4 = vcmp.lt.s32.totalorder %v1934_v25, 1  ;;  %v1980_v56 = vrot.slane %v1937_v27, %v462_v50  ;;  %p1519_p6 = scmp.ne.s32.totalorder %s2152_s29, %s1518_s8  ;;  %p2217_p5 = scmp.ne.s32.totalorder %s2209_s13, 0 }
  0xa4   : > { %v1983_v57 = vrot.slane %v1940_v29, %v462_v50  ;;  %vm474_vm5 = vcmp.lt.s32.totalorder %v1934_v25, 127  ;;  %v1995_v63 = vrot.slane %v1937_v27, %v479_v53  ;;  %v1998_v3 = vrot.slane %v1940_v29, %v479_v53  ;;  %v538_v50 = vld [vmem:[#allocation7] sm:$0xff] }
  0xa5   : > { %vm491_vm6 = vcmp.lt.s32.totalorder %v1934_v25, 113  ;;  %vm508_vm7 = vcmp.lt.s32.totalorder %v1934_v25, 112  ;;  %vm525_vm8 = vcmp.lt.s32.totalorder %v1934_v25, 111  ;;  %p1520_p7 = pnand %p1519_p6, %p2217_p5 }
  0xa7   : > { %p1521_p9 = pneg %p1520_p7 }
 0x173   : > { %v376_v4 = vpop.f32.mrb[0].mxu1 }
 0x174   : > { %v378_v5 = vpop.f32.mrb[1].mxu1 }
 0x175   : > { %v381_v6 = vadd.f32 %v378_v5, %v376_v4 }
 0x177   : > { %382 = vadd.xlane.f32.xlu0 %v381_v6 }
 0x204   : > { %v383_v7 = vpop.xlane.xlu0 %382 }
 0x205   : > { %v385_v8 = vmul.f32 0.00390625, %v383_v7 }
 0x207   : > { %v386_v9 = vsub.f32 %v376_v4, %v385_v8  ;;  %v387_v10 = vsub.f32 %v378_v5, %v385_v8 }
 0x209   : > { %v388_v11 = vmul.f32 %v386_v9, %v386_v9  ;;  %v389_v12 = vmul.f32 %v387_v10, %v387_v10 }
 0x20b   : > { %v390_v13 = vadd.f32 %v389_v12, %v388_v11 }
 0x20d   : > { %391 = vadd.xlane.f32.xlu0 %v390_v13 }
 0x29a   : > { %v392_v14 = vpop.xlane.xlu0 %391 }
 0x29b   : > { %v393_v15 = vmul.f32 0.00390625, %v392_v14  ;;  %v496_v14 = vsub.s32 6, %v1932_v23 }
 0x29d   : > { %v394_v16 = vadd.f32 1e-05, %v393_v15  ;;  %v2019_v28 = vrot.slane %v1940_v29, %v496_v14 }
 0x29f   : > { %1364 = vrsqrt.f32 %v394_v16 }
 0x2a9   : > { %v1365_v17 = vpop.eup %1364 }
 0x2aa   : > { %v396_v18 = vmul.f32 %v1365_v17, %v386_v9  ;;  %v397_v19 = vmul.f32 %v1365_v17, %v387_v10  ;;  %v513_v17 = vsub.s32 7, %v1932_v23 }
 0x2ac   : > { %v1896_v20 = vmax.f32 %v396_v18, 0.0  ;;  %v1902_v21 = vmax.f32 %v397_v19, 0.0  ;;  %v2023_v23 = vrot.slane %v1937_v27, %v513_v17 }
 0x2ae   : > { %419 = vrot.lane.b32.xlu0 %v1896_v20, %s1604_s25  ;;  %400 = vrot.lane.b32.xlu1 %v1896_v20, %s1605_s23 }
 0x2b2   : > { %472 = vrot.lane.b32.xlu0 %v1902_v21, %s1606_s30  ;;  %402 = vrot.lane.b32.xlu1 %v1902_v21, %s1605_s23 }
 0x2b6   : > { %489 = vrot.lane.b32.xlu0 %v1902_v21, %s1607_s11  ;;  %421 = vrot.lane.b32.xlu1 %v1902_v21, %s1604_s25 }
 0x2ba   : > { %506 = vrot.lane.b32.xlu0 %v1902_v21, %s1608_s16  ;;  %436 = vrot.lane.b32.xlu1 %v1896_v20, %s1609_s6 }
 0x2be   : > { %523 = vrot.lane.b32.xlu0 %v1902_v21, %s1610_s28  ;;  %438 = vrot.lane.b32.xlu1 %v1902_v21, %s1609_s6 }
 0x2c2   : > { %453 = vrot.lane.b32.xlu1 %v1896_v20, %s1611_s22 }
 0x2c6   : > { %455 = vrot.lane.b32.xlu1 %v1902_v21, %s1611_s22 }
 0x2ca   : > { %470 = vrot.lane.b32.xlu1 %v1896_v20, %s1606_s30 }
 0x2ce   : > { %487 = vrot.lane.b32.xlu1 %v1896_v20, %s1607_s11 }
 0x2d2   : > { %504 = vrot.lane.b32.xlu1 %v1896_v20, %s1608_s16 }
 0x2d6   : > { %521 = vrot.lane.b32.xlu1 %v1896_v20, %s1610_s28 }
 0x320   : > { %v401_v24 = vpop.permute.xlu1 %400  ;;  %v420_v37 = vpop.permute.xlu0 %419 }
 0x324   : > { %v403_v30 = vpop.permute.xlu1 %402  ;;  %v473_v54 = vpop.permute.xlu0 %472 }
 0x325   : > { %v407_v35 = vsel %vm406_vm1, %v401_v24, %v403_v30  ;;  %v408_v36 = vsel %vm406_vm1, %v403_v30, %v401_v24  ;;  %v2016_v24 = vrot.slane %v1937_v27, %v496_v14  ;;  %v632_v14 = vld [vmem:[#allocation8] sm:$0xff] }
 0x326   : > { %v417_v41 = vmul.f32 %v1944_v31, %v408_v36  ;;  %v418_v42 = vmul.f32 %v1947_v32, %v407_v35 }
 0x328   : > { %v422_v38 = vpop.permute.xlu1 %421  ;;  %v490_v8 = vpop.permute.xlu0 %489 }
 0x329   : > { %v424_v39 = vsel %vm423_vm2, %v420_v37, %v422_v38  ;;  %v425_v40 = vsel %vm423_vm2, %v422_v38, %v420_v37 }
 0x32a   : > { %v434_v43 = vmul.f32 %v1951_v33, %v425_v40  ;;  %v435_v44 = vmul.f32 %v1954_v34, %v424_v39  ;;  %v2041_v40 = vld [vmem:[#allocation10 + $0x18] ss:$0 sm:$0xff] }
 0x32c   : > { %v1234_v45 = vpack.c.bf16 %v434_v43, %v417_v41  ;;  %v437_v46 = vpop.permute.xlu1 %436  ;;  %v1232_v47 = vpack.c.bf16 %v435_v44, %v418_v42  ;;  %v507_v26 = vpop.permute.xlu0 %506 }
 0x32e   : > { %1233 = vmatprep.subr.bf16.mxu1 %v1232_v47 }
 0x32f   : > { %1235 = vmatpush1.bf16.msra.mxu1 %v1234_v45 }
 0x330   : > { %v439_v48 = vpop.permute.xlu1 %438  ;;  %v524_v41 = vpop.permute.xlu0 %523 }
 0x331   : > { %v441_v58 = vsel %vm440_vm3, %v437_v46, %v439_v48  ;;  %v442_v59 = vsel %vm440_vm3, %v439_v48, %v437_v46  ;;  %v2045_v46 = vld [vmem:[#allocation10 + $0x10] ss:$0 sm:$0xff] }
 0x332   : > { %v451_v4 = vmul.f32 %v1972_v52, %v442_v59  ;;  %v452_v5 = vmul.f32 %v1976_v55, %v441_v58 }
 0x334   : > { %v454_v51 = vpop.permute.xlu1 %453 }
 0x338   : > { %v456_v60 = vpop.permute.xlu1 %455 }
 0x339   : > { %v458_v61 = vsel %vm457_vm4, %v454_v51, %v456_v60  ;;  %v459_v62 = vsel %vm457_vm4, %v456_v60, %v454_v51 }
 0x33a   : > { %v468_v6 = vmul.f32 %v1980_v56, %v459_v62  ;;  %v469_v7 = vmul.f32 %v1983_v57, %v458_v61 }
 0x33c   : > { %v1238_v9 = vpack.c.bf16 %v468_v6, %v451_v4  ;;  %v471_v10 = vpop.permute.xlu1 %470  ;;  %v1236_v11 = vpack.c.bf16 %v469_v7, %v452_v5 }
 0x33d   : > { %v475_v12 = vsel %vm474_vm5, %v471_v10, %v473_v54  ;;  %v476_v13 = vsel %vm474_vm5, %v473_v54, %v471_v10 }
 0x33e   : > { %v485_v15 = vmul.f32 %v1995_v63, %v475_v12  ;;  %v486_v16 = vmul.f32 %v1998_v3, %v476_v13  ;;  %1237 = vmatprep.subr.bf16.mxu1 %v1236_v11 }
 0x33f   : > { %1239 = vmatpush1.bf16.msra.mxu1 %v1238_v9 }
 0x340   : > { %v1242_v18 = vpack.c.bf16 %v485_v15, %v1896_v20  ;;  %v488_v19 = vpop.permute.xlu1 %487  ;;  %v1240_v22 = vpack.c.bf16 %v486_v16, %v1902_v21  ;;  %v2026_v20 = vrot.slane %v1940_v29, %v513_v17 }
 0x341   : > { %v492_v30 = vsel %vm491_vm6, %v488_v19, %v490_v8  ;;  %v493_v21 = vsel %vm491_vm6, %v490_v8, %v488_v19 }
 0x342   : > { %1241 = vmatprep.subr.bf16.mxu1 %v1240_v22  ;;  %v502_v27 = vmul.f32 %v2016_v24, %v492_v30  ;;  %v503_v29 = vmul.f32 %v2019_v28, %v493_v21 }
 0x343   : > { %1243 = vmatpush1.bf16.msra.mxu1 %v1242_v18 }
 0x344   : > { %v505_v35 = vpop.permute.xlu1 %504 }
 0x345   : > { %v509_v36 = vsel %vm508_vm7, %v505_v35, %v507_v26  ;;  %v510_v37 = vsel %vm508_vm7, %v507_v26, %v505_v35 }
 0x346   : > { %v519_v38 = vmul.f32 %v2023_v23, %v509_v36  ;;  %v520_v39 = vmul.f32 %v2026_v20, %v510_v37 }
 0x348   : > { %v1246_v42 = vpack.c.bf16 %v519_v38, %v502_v27  ;;  %v522_v43 = vpop.permute.xlu1 %521  ;;  %v1244_v44 = vpack.c.bf16 %v520_v39, %v503_v29 }
 0x349   : > { %v527_v45 = vsel %vm525_vm8, %v524_v41, %v522_v43  ;;  %v526_v47 = vsel %vm525_vm8, %v522_v43, %v524_v41 }
 0x34a   : > { %v537_v48 = vmul.f32 %v2041_v40, %v527_v45  ;;  %1245 = vmatprep.subr.bf16.mxu1 %v1244_v44  ;;  %v536_v49 = vmul.f32 %v2045_v46, %v526_v47  ;;  %v728_v45 = vld [vmem:[#allocation5 + $0x8] sm:$0xff] }
 0x34b   : > { %1247 = vmatpush1.bf16.msra.mxu1 %v1246_v42 }
 0x34c   : > { %559 = vmatprep.subr.mxu1 %v537_v48 }
 0x34f   : > { %560 = vmatpush1.msra.mxu1 %v536_v49 }
 0x350   : > { %1220 = vmatmul.mubr.msk.f32.vlgmr.msra.gmra.mrb[2].mxu1 %vm539_vm9, %v538_v50 }
 0x351   : > { %1048 = vmatprep.mubr.f32.mxu1 %v1603_v0 }
 0x423   : > { %v609_v51 = vpop.f32.mrb[2].mxu1 }
 0x424   : > { %v611_v53 = vpop.f32.mrb[3].mxu1 }
 0x425   : > { %v614_v54 = vadd.f32 %v611_v53, %v609_v51 }
 0x427   : > { %615 = vadd.xlane.f32.xlu1 %v614_v54 }
 0x4b4   : > { %v616_v58 = vpop.xlane.xlu1 %615 }
 0x4b5   : > { %v617_v59 = vmul.f32 0.00390625, %v616_v58 }
 0x4b7   : > { %v618_v60 = vsub.f32 %v609_v51, %v617_v59  ;;  %v619_v61 = vsub.f32 %v611_v53, %v617_v59 }
 0x4b9   : > { %v620_v62 = vmul.f32 %v618_v60, %v618_v60  ;;  %v621_v4 = vmul.f32 %v619_v61, %v619_v61 }
 0x4bb   : > { %v622_v5 = vadd.f32 %v621_v4, %v620_v62 }
 0x4bd   : > { %623 = vadd.xlane.f32.xlu0 %v622_v5 }
 0x54a   : > { %v624_v6 = vpop.xlane.xlu0 %623 }
 0x54b   : > { %v625_v7 = vmul.f32 0.00390625, %v624_v6 }
 0x54d   : > { %v626_v8 = vadd.f32 1e-05, %v625_v7 }
 0x54f   : > { %1366 = vrsqrt.f32 %v626_v8 }
 0x559   : > { %v1367_v9 = vpop.eup %1366 }
 0x55a   : > { %v629_v10 = vmul.f32 %v1367_v9, %v619_v61  ;;  %v628_v11 = vmul.f32 %v1367_v9, %v618_v60 }
 0x55c   : > { %v631_v12 = vmax.f32 %v629_v10, 0.0  ;;  %v630_v13 = vmax.f32 %v628_v11, 0.0 }
 0x55e   : > { %636 = vmatprep.subr.mxu0 %v631_v12 }
 0x55f   : > { %637 = vmatpush1.msra.mxu0 %v630_v13 }
 0x560   : > { %1221 = vmatmul.mubr.msk.f32.vlgmr.msra.gmra.mrb[0].mxu0 %vm306_vm0, %v632_v14 }
 0x561   : > { %796 = vmatprep.mubr.f32.mxu0 %v1603_v0 }
 0x633   : > { %v702_v15 = vpop.f32.mrb[0].mxu0 }
 0x634   : > { %v704_v16 = vpop.f32.mrb[1].mxu0 }
 0x635   : > { %v707_v17 = vadd.f32 %v704_v16, %v702_v15 }
 0x637   : > { %708 = vadd.xlane.f32.xlu0 %v707_v17 }
 0x6c4   : > { %v709_v18 = vpop.xlane.xlu0 %708 }
 0x6c5   : > { %v710_v19 = vmul.f32 0.00390625, %v709_v18 }
 0x6c7   : > { %v711_v22 = vsub.f32 %v702_v15, %v710_v19  ;;  %v712_v26 = vsub.f32 %v704_v16, %v710_v19 }
 0x6c9   : > { %v713_v30 = vmul.f32 %v711_v22, %v711_v22  ;;  %v714_v21 = vmul.f32 %v712_v26, %v712_v26 }
 0x6cb   : > { %v715_v35 = vadd.f32 %v714_v21, %v713_v30 }
 0x6cd   : > { %716 = vadd.xlane.f32.xlu1 %v715_v35 }
 0x75a   : > { %v717_v36 = vpop.xlane.xlu1 %716 }
 0x75b   : > { %v718_v37 = vmul.f32 0.00390625, %v717_v36 }
 0x75d   : > { %v719_v27 = vadd.f32 1e-05, %v718_v37 }
 0x75f   : > { %1368 = vrsqrt.f32 %v719_v27 }
 0x769   : > { %v1369_v29 = vpop.eup %1368 }
 0x76a   : > { %v722_v38 = vmul.f32 %v1369_v29, %v712_v26  ;;  %v721_v39 = vmul.f32 %v1369_v29, %v711_v22 }
 0x76c   : > { %v724_v41 = vmax.f32 %v722_v38, 0.0  ;;  %v723_v42 = vmax.f32 %v721_v39, 0.0 }
 0x76e   : > { %v2056_v43 = vadd.f32 %v724_v41, %v1888_v1  ;;  %v2059_v44 = vadd.f32 %v723_v42, %v1890_v2 }
 0x770   : > { %732 = vmatprep.subr.mxu0 %v2056_v43 }
 0x771   : > { %733 = vmatpush1.msra.mxu0 %v2059_v44 }
 0x772   : > { %1222 = vmatmul.mubr.msk.f32.vlgmr.msra.gmra.mrb[2].mxu0 %vm306_vm0, %v728_v45 }
 0x773   : > { %954 = vmatprep.mubr.f32.mxu0 %v1603_v0 }
 0x845   : > { %v798_v47 = vpop.f32.mrb[2].mxu0 }
 0x846   : > { %v800_v48 = vpop.f32.mrb[3].mxu0 }
 0x847   : > { %v803_v49 = vadd.f32 %v800_v48, %v798_v47 }
 0x849   : > { %804 = vadd.xlane.f32.xlu0 %v803_v49 }
 0x8d6   : > { %v805_v50 = vpop.xlane.xlu0 %804 }
 0x8d7   : > { %v806_v51 = vmul.f32 0.00390625, %v805_v50 }
 0x8d9   : > { %v807_v1 = vsub.f32 %v798_v47, %v806_v51  ;;  %v808_v53 = vsub.f32 %v800_v48, %v806_v51 }
 0x8db   : > { %v809_v54 = vmul.f32 %v807_v1, %v807_v1  ;;  %v810_v2 = vmul.f32 %v808_v53, %v808_v53 }
 0x8dd   : > { %v811_v58 = vadd.f32 %v810_v2, %v809_v54 }
 0x8df   : > { %812 = vadd.xlane.f32.xlu1 %v811_v58 }
 0x96c   : > { %v813_v59 = vpop.xlane.xlu1 %812 }
 0x96d   : > { %v814_v60 = vmul.f32 0.00390625, %v813_v59 }
 0x96f   : > { %v815_v61 = vadd.f32 1e-05, %v814_v60 }
 0x971   : > { %1370 = vrsqrt.f32 %v815_v61 }
 0x97b   : > { %v1371_v62 = vpop.eup %1370 }
 0x97c   : > { %v817_v4 = vmul.f32 %v1371_v62, %v807_v1  ;;  %v818_v5 = vmul.f32 %v1371_v62, %v808_v53 }
 0x97e   : > { %v2065_v0 = vmax.f32 %v817_v4, 0.0  ;;  %v820_v6 = vmax.f32 %v818_v5, 0.0 }
 0x980   : > { %823 = vrot.lane.b32.xlu1 %v820_v6, %s1605_s23  ;;  %821 = vrot.lane.b32.xlu0 %v2065_v0, %s1605_s23 }
 0x984   : > { %829 = vrot.lane.b32.xlu1 %v2065_v0, %s1604_s25  ;;  %831 = vrot.lane.b32.xlu0 %v820_v6, %s1604_s25  ;;  %s1612_s25 = smov [#allocation11]  }
 0x985   : > { %s1522_s23 = sshll.u32 %s1612_s25, 4  ;;  %s1523_s23 = int_to_ptr.vmem [resolvable:$false] %s1522_s23 }
 0x986   : > { %p1525_p12 = scmp.lt.s32.totalorder %s2152_s29, %s1523_s23 }
 0x988   : > { %837 = vrot.lane.b32.xlu1 %v2065_v0, %s1609_s6  ;;  %839 = vrot.lane.b32.xlu0 %v820_v6, %s1609_s6 }
 0x98c   : > { %845 = vrot.lane.b32.xlu1 %v2065_v0, %s1611_s22  ;;  %847 = vrot.lane.b32.xlu0 %v820_v6, %s1611_s22 }
 0x990   : > { %853 = vrot.lane.b32.xlu1 %v2065_v0, %s1606_s30  ;;  %855 = vrot.lane.b32.xlu0 %v820_v6, %s1606_s30  ;;  %s1524_s30 = scalar_lea.vmem %s1523_s23, 512 }
 0x991   : > { %p1526_p3 = scmp.lt.s32.totalorder %s1524_s30, %s1518_s8 }
 0x993   : > { %p1527_p13 = por %p1526_p3, %p1525_p12 }
 0x994   : > { %861 = vrot.lane.b32.xlu1 %v2065_v0, %s1607_s11  ;;  %863 = vrot.lane.b32.xlu0 %v820_v6, %s1607_s11 }
 0x995   : > { %p1528_p0 = pnand %p1527_p13, %p1521_p9 }
 0x998   : > { %869 = vrot.lane.b32.xlu1 %v2065_v0, %s1608_s16  ;;  %871 = vrot.lane.b32.xlu0 %v820_v6, %s1608_s16 }
 0x99c   : > { %877 = vrot.lane.b32.xlu1 %v2065_v0, %s1610_s28  ;;  %879 = vrot.lane.b32.xlu0 %v820_v6, %s1610_s28 }
 0x9f2   : > { %v824_v7 = vpop.permute.xlu1 %823  ;;  %v822_v8 = vpop.permute.xlu0 %821 }
 0x9f3   : > { %v825_v9 = vsel %vm406_vm1, %v822_v8, %v824_v7  ;;  %v826_v10 = vsel %vm406_vm1, %v824_v7, %v822_v8 }
 0x9f4   : > { %v827_v15 = vmul.f32 %v826_v10, %v1944_v31  ;;  %v828_v16 = vmul.f32 %v825_v9, %v1947_v32 }
 0x9f6   : > { %v830_v11 = vpop.permute.xlu1 %829  ;;  %v832_v12 = vpop.permute.xlu0 %831 }
 0x9f7   : > { %v833_v13 = vsel %vm423_vm2, %v830_v11, %v832_v12  ;;  %v834_v14 = vsel %vm423_vm2, %v832_v12, %v830_v11 }
 0x9f8   : > { %v835_v17 = vmul.f32 %v834_v14, %v1951_v33  ;;  %v836_v18 = vmul.f32 %v833_v13, %v1954_v34 }
 0x9fa   : > { %v1250_v19 = vpack.c.bf16 %v835_v17, %v827_v15  ;;  %v838_v22 = vpop.permute.xlu1 %837  ;;  %v840_v26 = vpop.permute.xlu0 %839  ;;  %v1248_v30 = vpack.c.bf16 %v836_v18, %v828_v16 }
 0x9fb   : > { %v841_v21 = vsel %vm440_vm3, %v838_v22, %v840_v26  ;;  %v842_v35 = vsel %vm440_vm3, %v840_v26, %v838_v22  ;;  %v980_v22 = vld [vmem:[#allocation8 + $0x8] sm:$0xff] }
 0x9fc   : > { %1249 = vmatprep.subr.bf16.mxu0 %v1248_v30  ;;  %v843_v34 = vmul.f32 %v842_v35, %v1972_v52  ;;  %v844_v37 = vmul.f32 %v841_v21, %v1976_v55 }
 0x9fd   : > { %1251 = vmatpush1.bf16.msra.mxu0 %v1250_v19 }
 0x9fe   : > { %v846_v36 = vpop.permute.xlu1 %845  ;;  %v848_v31 = vpop.permute.xlu0 %847 }
 0x9ff   : > { %v849_v32 = vsel %vm457_vm4, %v846_v36, %v848_v31  ;;  %v850_v33 = vsel %vm457_vm4, %v848_v31, %v846_v36 }
 0xa00   : > { %v851_v27 = vmul.f32 %v850_v33, %v1980_v56  ;;  %v852_v29 = vmul.f32 %v849_v32, %v1983_v57 }
 0xa02   : > { %v1254_v38 = vpack.c.bf16 %v851_v27, %v843_v34  ;;  %v854_v39 = vpop.permute.xlu1 %853  ;;  %v856_v41 = vpop.permute.xlu0 %855  ;;  %v1252_v42 = vpack.c.bf16 %v852_v29, %v844_v37 }
 0xa03   : > { %v857_v45 = vsel %vm474_vm5, %v854_v39, %v856_v41  ;;  %v858_v47 = vsel %vm474_vm5, %v856_v41, %v854_v39 }
 0xa04   : > { %v859_v48 = vmul.f32 %v857_v45, %v1995_v63  ;;  %v860_v52 = vmul.f32 %v858_v47, %v1998_v3  ;;  %1253 = vmatprep.subr.bf16.mxu0 %v1252_v42 }
 0xa05   : > { %1255 = vmatpush1.bf16.msra.mxu0 %v1254_v38 }
 0xa06   : > { %v1258_v55 = vpack.c.bf16 %v859_v48, %v2065_v0  ;;  %v862_v56 = vpop.permute.xlu1 %861  ;;  %v864_v57 = vpop.permute.xlu0 %863  ;;  %v1256_v49 = vpack.c.bf16 %v860_v52, %v820_v6 }
 0xa07   : > { %v865_v50 = vsel %vm491_vm6, %v862_v56, %v864_v57  ;;  %v866_v51 = vsel %vm491_vm6, %v864_v57, %v862_v56 }
 0xa08   : > { %1257 = vmatprep.subr.bf16.mxu0 %v1256_v49  ;;  %v867_v54 = vmul.f32 %v865_v50, %v2016_v24  ;;  %v868_v2 = vmul.f32 %v866_v51, %v2019_v28  ;;  %v886_v28 = vld [vmem:[#allocation7 + $0x8] sm:$0xff] }
 0xa09   : > { %1259 = vmatpush1.bf16.msra.mxu0 %v1258_v55 }
 0xa0a   : > { %v870_v1 = vpop.permute.xlu1 %869  ;;  %v872_v53 = vpop.permute.xlu0 %871 }
 0xa0b   : > { %v873_v63 = vsel %vm508_vm7, %v870_v1, %v872_v53  ;;  %v874_v3 = vsel %vm508_vm7, %v872_v53, %v870_v1 }
 0xa0c   : > { %v875_v58 = vmul.f32 %v873_v63, %v2023_v23  ;;  %v876_v59 = vmul.f32 %v874_v3, %v2026_v20 }
 0xa0e   : > { %v1262_v60 = vpack.c.bf16 %v875_v58, %v867_v54  ;;  %v878_v61 = vpop.permute.xlu1 %877  ;;  %v880_v62 = vpop.permute.xlu0 %879  ;;  %v1260_v4 = vpack.c.bf16 %v876_v59, %v868_v2 }
 0xa0f   : > { %v882_v5 = vsel %vm525_vm8, %v880_v62, %v878_v61  ;;  %v881_v0 = vsel %vm525_vm8, %v878_v61, %v880_v62 }
 0xa10   : > { %v884_v6 = vmul.f32 %v2041_v40, %v882_v5  ;;  %1261 = vmatprep.subr.bf16.mxu0 %v1260_v4  ;;  %v883_v24 = vmul.f32 %v2045_v46, %v881_v0 }
 0xa11   : > { %1263 = vmatpush1.bf16.msra.mxu0 %v1262_v60 }
 0xa12   : > { %906 = vmatprep.subr.mxu0 %v884_v6 }
 0xa15   : > { %907 = vmatpush1.msra.mxu0 %v883_v24 }
 0xa16   : > { %1223 = vmatmul.mubr.msk.f32.vlgmr.msra.gmra.mrb[4].mxu0 %vm539_vm9, %v886_v28 }
 0xae9   : > { %v956_v23 = vpop.f32.mrb[4].mxu0 }
 0xaea   : > { %v958_v20 = vpop.f32.mrb[5].mxu0 }
 0xaeb   : > { %v961_v7 = vadd.f32 %v958_v20, %v956_v23 }
 0xaed   : > { %962 = vadd.xlane.f32.xlu1 %v961_v7 }
 0xb7a   : > { %v963_v8 = vpop.xlane.xlu1 %962 }
 0xb7b   : > { %v964_v9 = vmul.f32 0.00390625, %v963_v8 }
 0xb7d   : > { %v965_v10 = vsub.f32 %v956_v23, %v964_v9  ;;  %v966_v25 = vsub.f32 %v958_v20, %v964_v9 }
 0xb7f   : > { %v967_v11 = vmul.f32 %v965_v10, %v965_v10  ;;  %v968_v12 = vmul.f32 %v966_v25, %v966_v25 }
 0xb81   : > { %v969_v40 = vadd.f32 %v968_v12, %v967_v11 }
 0xb83   : > { %970 = vadd.xlane.f32.xlu0 %v969_v40 }
 0xc10   : > { %v971_v13 = vpop.xlane.xlu0 %970 }
 0xc11   : > { %v972_v14 = vmul.f32 0.00390625, %v971_v13 }
 0xc13   : > { %v973_v15 = vadd.f32 1e-05, %v972_v14 }
 0xc15   : > { %1372 = vrsqrt.f32 %v973_v15 }
 0xc1f   : > { %v1373_v46 = vpop.eup %1372 }
 0xc20   : > { %v976_v16 = vmul.f32 %v1373_v46, %v966_v25  ;;  %v975_v17 = vmul.f32 %v1373_v46, %v965_v10 }
 0xc22   : > { %v978_v18 = vmax.f32 %v976_v16, 0.0  ;;  %v977_v19 = vmax.f32 %v975_v17, 0.0 }
 0xc24   : > { %984 = vmatprep.subr.mxu1 %v978_v18 }
 0xc25   : > { %985 = vmatpush1.msra.mxu1 %v977_v19 }
 0xc26   : > { %1224 = vmatmul.mubr.msk.f32.vlgmr.msra.gmra.mrb[4].mxu1 %vm306_vm0, %v980_v22 }
 0xcf9   : > { %v1050_v26 = vpop.f32.mrb[4].mxu1 }
 0xcfa   : > { %v1052_v30 = vpop.f32.mrb[5].mxu1 }
 0xcfb   : > { %v1055_v21 = vadd.f32 %v1052_v30, %v1050_v26 }
 0xcfd   : > { %1056 = vadd.xlane.f32.xlu0 %v1055_v21 }
 0xd8a   : > { %v1057_v35 = vpop.xlane.xlu0 %1056 }
 0xd8b   : > { %v1058_v36 = vmul.f32 0.00390625, %v1057_v35 }
 0xd8d   : > { %v1059_v31 = vsub.f32 %v1050_v26, %v1058_v36  ;;  %v1060_v32 = vsub.f32 %v1052_v30, %v1058_v36 }
 0xd8f   : > { %v1061_v33 = vmul.f32 %v1059_v31, %v1059_v31  ;;  %v1062_v34 = vmul.f32 %v1060_v32, %v1060_v32 }
 0xd91   : > { %v1063_v37 = vadd.f32 %v1062_v34, %v1061_v33 }
 0xd93   : > { %1064 = vadd.xlane.f32.xlu1 %v1063_v37 }
 0xe20   : > { %v1065_v27 = vpop.xlane.xlu1 %1064 }
 0xe21   : > { %v1066_v29 = vmul.f32 0.00390625, %v1065_v27 }
 0xe23   : > { %v1067_v38 = vadd.f32 1e-05, %v1066_v29 }
 0xe25   : > { %1374 = vrsqrt.f32 %v1067_v38 }
 0xe2f   : > { %v1375_v39 = vpop.eup %1374 }
 0xe30   : > { %v1069_v41 = vmul.f32 %v1375_v39, %v1059_v31  ;;  %v1070_v42 = vmul.f32 %v1375_v39, %v1060_v32 }
 0xe32   : > { %v1071_v45 = vmax.f32 %v1069_v41, 0.0  ;;  %v1072_v47 = vmax.f32 %v1070_v42, 0.0 }
 0xe34   : > { %v1073_v48 = vadd.f32 %v1071_v45, %v2059_v44  ;;  %v1074_v52 = vadd.f32 %v1072_v47, %v2056_v43 }
 0xe36   : > { %1075 = vst [vmem:[%s298_s26] sm:$0xff] %v1073_v48  ;;  %1076 = vst [vmem:[%s298_s26 + $0x8] sm:$0xff] %v1074_v52 }
 0xe37   : > { %1531 = shalt.err (!%p1528_p0)
}
 0xe38   : > { %s1532_s7 = scalar_lea.hbm %s2150_s17, 256  ;;  %s1536_s6 = scalar_lea.hbm %s2199_s5, 512 }
 0xe39   : > { %p1533_p2 = scmp.ne.s32.totalorder %s2150_s17, %s1532_s7  ;;  %p1537_p10 = scmp.lt.u32.totalorder %s2150_s17, %s2199_s5 }
 0xe3a   : > { %p1538_p11 = scmp.lt.u32.totalorder %s1536_s6, %s1532_s7  ;;  %p1540_p6 = scmp.lt.u32.totalorder %s1532_s7, %s2150_s17 }
 0xe3b   : > { %p1534_p8 = pnand %p1533_p2, %p2217_p5 }
 0xe3c   : > { %p1539_p1 = por %p1538_p11, %p1537_p10 }
 0xe3d   : > { %p1535_p4 = pneg %p1534_p8 }
 0xe3e   : > { %p1541_p7 = por %p1540_p6, %p1539_p1 }
 0xe40   : > { %p1542_p9 = pnand %p1541_p7, %p1535_p4 }
 0xe42   : > { %1545 = shalt.err (!%p1542_p9)
}
 0xe43   : > { %1282 = dma.vmem_to_hbm [thread:$0]  (%p2217_p5), %s2152_s29, 256, %s2150_s17, %s1078_s24  }
 0xe44 PF: > { %s1104_s12 = sand.u32 1, %s1580_s18   ;;  %p2218_p12 = scmp.ne.s32.totalorder %s2210_s14, 0 }
 0xe45   : > { %p2219_p3 = scmp.ge.s32.totalorder %s1592_s21, 2  ;;  %s1105_s26 = scalar_lea.sflag [#allocation4], %s1104_s12 }
 0xe47   : > { %p1302_p13 = pnand %p2219_p3, %p2218_p12 }
 0xe49   : > { %1575 = dma.done.wait (!%p1302_p13), %s1105_s26, 256  }
 0xe4a   : > { %1577 = vsyncadd (!%p1302_p13), %s1105_s26, 4294967040  ;;  %p20_p0 = scmp.ge.s32.totalorder %s1792_s27, 4   ;;  %s2220_s18 = smov %s1584_s19 }
 0xe4b   : > { %s2221_s19 = smov %s1588_s20  ;;  %s2222_s20 = smov %s1803_s10 }
 0xe4c   : > { %s2223_s21 = smov %s1792_s27  ;;  %22 = sbr.rel (!%p20_p0) target bundleno = 7 (0x7), region = 104 }
 0xe53   :  { %1110 = vsyncpa [#allocation3], 1 }
 0xe54   :  { %1112 = vsyncpa [#allocation3 + $0x1], 1 }
 0xe55   :  { %1113 = vsyncpa [#allocation6], 1 }
 0xe56   :  { %1114 = vsyncpa [#allocation9], 1 }
 0xe57   :  { %1115 = vsyncpa [#allocation4], 1 }
 0xe58   :  { %1117 = vsyncpa [#allocation4 + $0x1], 1 }

</bundles_post_ra>
